<compile_context>
chip_gen: v6e
topology: v6e:2x2x1
jax: 0.10.0
libtpu: 0.0.40
codegen_flags: <defaults>
</compile_context>

<pallas_src>
import functools

import jax
import jax.numpy as jnp
from jax.experimental import pallas as pl
from jax.experimental.pallas import tpu as pltpu


def _round_up(x: int, m: int) -> int:
    return ((x + m - 1) // m) * m


def _cdiv(a: int, b: int) -> int:
    return (a + b - 1) // b


def _pick_tn(n: int, cap: int) -> int:
    """Lane-tile size: multiple of 128, <= cap, preferring an exact divisor of n
    (so no tail masking is needed); otherwise the cap + in-kernel masking."""
    n128 = _round_up(n, 128)
    if n128 <= cap:
        return n128
    if n % 128 == 0:
        units = n // 128
        for u in range(cap // 128, 0, -1):
            if u * 128 < cap // 2:
                break
            if units % u == 0:
                return u * 128
    return cap


def _heatmap_loss_kernel(pred_ref, gt_ref, out_ref, *, inv_n, lane_tiles, tn,
                         n_valid, apply_mask, split_k):
    # pred_ref, gt_ref : (TB, TN) native dtype (VMEM)
    # out_ref          : (TB, 128) f32, resident across the reduction axis;
    #                    doubles as the accumulator.
    k = pl.program_id(1)
    num_k = pl.num_programs(1)

    @pl.when(k == 0)
    def _init():
        out_ref[...] = jnp.zeros_like(out_ref)

    # Upcast in-kernel (VPU) and square the difference in f32.
    d = pred_ref[...].astype(jnp.float32) - gt_ref[...].astype(jnp.float32)
    sq = d * d

    if apply_mask:
        # Zero lanes beyond the true N (tail of the last reduction block, or
        # fully-padded duplicate blocks created by the 2-way k split).
        if split_k:
            block_idx = pl.program_id(0) * num_k + k
        else:
            block_idx = k
        limit = n_valid - block_idx * tn          # may be <= 0 (fully masked)
        lane_ids = jax.lax.broadcasted_iota(jnp.int32, sq.shape, 1)
        sq = jnp.where(lane_ids < limit, sq, 0.0)

    # VPU-only partial reduction: tree-sum the 128-lane, vreg-aligned chunks
    # (bounded dependent-add depth), then accumulate into the resident output
    # block.  The single cross-lane (XLU) reduce is deferred to the epilogue.
    chunks = [sq[:, t * 128:(t + 1) * 128] for t in range(lane_tiles)]
    while len(chunks) > 1:
        nxt = [chunks[i] + chunks[i + 1] for i in range(0, len(chunks) - 1, 2)]
        if len(chunks) % 2:
            nxt.append(chunks[-1])
        chunks = nxt
    out_ref[...] += chunks[0]

    @pl.when(k == num_k - 1)
    def _epilogue():
        total = jnp.sum(out_ref[...], axis=1, keepdims=True)   # (TB, 1) XLU reduce
        out_ref[...] = jnp.broadcast_to(total * inv_n, out_ref.shape)


def heatmap_loss(pred, gt):
    """pred, gt: (B, C, H, W) -> (B,) per-sample mean of (pred-gt)^2 over C,H,W."""
    assert pred.shape == gt.shape
    B, C, H, W = pred.shape
    N = C * H * W

    # Free (contiguous) reshape; inputs stay in native dtype.
    p = pred.reshape(B, N)
    g = gt.reshape(B, N)

    itemsize = jnp.dtype(p.dtype).itemsize
    sub = {4: 8, 2: 16, 1: 32}.get(itemsize, 8)       # sublane granularity

    # ---- tile sizing -------------------------------------------------------
    tn_cap = 16384 if itemsize >= 4 else 32768
    TN = _pick_tn(N, tn_cap)
    k_total = _cdiv(N, TN)

    # Batch tile: multiple of the sublane granularity, sized so each input
    # block is ~2 MiB, and small enough that the parallel axis has >= 2 tiles
    # whenever B allows (v7x megacore).  cdiv grid: no padding of B in HBM.
    block_bytes_cap = 2 * 1024 * 1024
    if B <= sub:
        TB = B                                        # full-dim block (allowed)
        batch_tiles = 1
    else:
        tb_vmem = max(sub, (block_bytes_cap // (TN * itemsize)) // sub * sub)
        tb_par = ((B - 1) // sub) * sub               # largest sub-multiple < B
        TB = max(sub, min(tb_vmem, tb_par))
        batch_tiles = _cdiv(B, TB)

    # v7x megacore for tiny batches: with a single batch tile, split the
    # reduction stream into two parallel halves writing distinct 128-lane
    # output columns (combined in the wrapper).
    split_k = (batch_tiles == 1) and (k_total >= 2)
    if split_k:
        n_split = 2
        K = _cdiv(k_total, n_split)
        grid = (n_split, K)
        in_map = lambda s, k: (0, jnp.minimum(s * K + k, k_total - 1))
        out_map = lambda s, k: (0, s)
        out_cols = n_split * 128
        covered = n_split * K * TN
    else:
        K = k_total
        grid = (batch_tiles, K)
        in_map = lambda i, k: (i, k)
        out_map = lambda i, k: (i, 0)
        out_cols = 128
        covered = K * TN

    apply_mask = covered != N
    inv_n = 1.0 / float(N)

    kernel = functools.partial(
        _heatmap_loss_kernel,
        inv_n=inv_n, lane_tiles=TN // 128, tn=TN, n_valid=N,
        apply_mask=apply_mask, split_k=split_k,
    )

    out = pl.pallas_call(
        kernel,
        out_shape=jax.ShapeDtypeStruct((B, out_cols), jnp.float32),
        grid_spec=pltpu.PrefetchScalarGridSpec(
            num_scalar_prefetch=0,
            grid=grid,
            in_specs=[
                pl.BlockSpec((TB, TN), in_map),
                pl.BlockSpec((TB, TN), in_map),
            ],
            # Output block resident across the reduction axis; doubles as the
            # accumulator; lane-dense 128-wide slab written back once per tile.
            out_specs=pl.BlockSpec((TB, 128), out_map),
        ),
        compiler_params=pltpu.CompilerParams(
            dimension_semantics=("parallel", "arbitrary"),
            vmem_limit_bytes=32 * 1024 * 1024,
        ),
        cost_estimate=pl.CostEstimate(
            flops=3 * B * N,
            transcendentals=0,
            bytes_accessed=2 * B * N * itemsize + B * out_cols * 4,
        ),
    )(p, g)

    if split_k:
        res = out[:, 0] + out[:, 128]
    else:
        res = out[:, 0]
    if jnp.issubdtype(pred.dtype, jnp.floating):
        res = res.astype(pred.dtype)
    return res


if __name__ == "__main__":
    key = jax.random.PRNGKey(0)

    def _check(k, shape):
        k1, k2 = jax.random.split(k)
        pred = jax.random.normal(k1, shape, dtype=jnp.float32)
        gt = jax.random.normal(k2, shape, dtype=jnp.float32)
        loss = jax.block_until_ready(heatmap_loss(pred, gt))
        ref = jnp.mean((pred - gt) ** 2, axis=(1, 2, 3))
        assert loss.shape == (shape[0],), (loss.shape, shape)
        assert jnp.allclose(loss, ref, rtol=2e-5, atol=1e-5), (loss, ref)
        return k2

    # 1) Primary small-shape check (module's intended NCHW input).
    key = _check(key, (2, 4, 16, 16))
    # 2) Single-step reduction, TB = full small batch, no masking.
    key = _check(key, (8, 17, 16, 16))
    # 3) Multi-step reduction with tiny batch: exercises the 2-way parallel
    #    k-split, the clamped duplicate block and in-kernel tail masking.
    key = _check(key, (2, 3, 128, 100))       # N = 38400 -> TN=12800, grid (2,2)
    # 4) Multiple batch tiles + lane-tail masking (N not a multiple of 128).
    key = _check(key, (16, 5, 13, 13))        # N = 845 -> TN=896, grid (2,1)
    # 5) Non-divisible batch (partial trailing batch block, no HBM padding).
    key = _check(key, (10, 4, 16, 16))        # grid (2,1), TB=8

    print("KERNEL_OK")
</pallas_src>

<mosaic_0001>
module attributes {stable_mosaic.version = 11 : i64} {
  func.func @_heatmap_loss_kernel(%arg0: i32, %arg1: i32, %arg2: memref<2x1024xf32, #tpu.memory_space<vmem>>, %arg3: memref<2x1024xf32, #tpu.memory_space<vmem>>, %arg4: memref<2x128xf32, #tpu.memory_space<vmem>>) attributes {dimension_semantics = [#tpu.dimension_semantics<parallel>, #tpu.dimension_semantics<arbitrary>], iteration_bounds = array<i64: 1, 1>, scalar_prefetch = 0 : i64, scratch_operands = 0 : i64, tpu.core_type = #tpu.core_type<tc>, window_params = [{transform_indices = @transform_0, window_bounds = array<i64: 2, 1024>}, {transform_indices = @transform_1, window_bounds = array<i64: 2, 1024>}, {transform_indices = @transform_2, window_bounds = array<i64: 2, 128>}]} {
    %c0_i32 = arith.constant 0 : i32
    %0 = arith.cmpi eq, %arg1, %c0_i32 : i32
    %1 = arith.extui %0 : i1 to i32
    %c0_i32_0 = arith.constant 0 : i32
    %2 = arith.cmpi ne, %1, %c0_i32_0 : i32
    scf.if %2 {
      %cst = arith.constant 0.000000e+00 : f32
      %28 = vector.broadcast %cst : f32 to vector<2x128xf32>
      %c0_10 = arith.constant 0 : index
      %c0_11 = arith.constant 0 : index
      %29 = vector.load %arg4[%c0_10, %c0_11] : memref<2x128xf32, #tpu.memory_space<vmem>>, vector<2x128xf32>
      tpu.vector_store %arg4[%c0_10, %c0_11], %28 {strides = array<i32>} : memref<2x128xf32, #tpu.memory_space<vmem>>, vector<2x128xf32>,
    } else {
    }
    %c0 = arith.constant 0 : index
    %c0_1 = arith.constant 0 : index
    %3 = vector.load %arg2[%c0, %c0_1] : memref<2x1024xf32, #tpu.memory_space<vmem>>, vector<2x1024xf32>
    %c0_2 = arith.constant 0 : index
    %c0_3 = arith.constant 0 : index
    %4 = vector.load %arg3[%c0_2, %c0_3] : memref<2x1024xf32, #tpu.memory_space<vmem>>, vector<2x1024xf32>
    %5 = arith.subf %3, %4 : vector<2x1024xf32>
    %6 = arith.mulf %5, %5 : vector<2x1024xf32>
    %7 = vector.extract_strided_slice %6 {offsets = [0, 0], sizes = [2, 128], strides = [1, 1]} : vector<2x1024xf32> to vector<2x128xf32>
    %8 = vector.extract_strided_slice %6 {offsets = [0, 128], sizes = [2, 128], strides = [1, 1]} : vector<2x1024xf32> to vector<2x128xf32>
    %9 = vector.extract_strided_slice %6 {offsets = [0, 256], sizes = [2, 128], strides = [1, 1]} : vector<2x1024xf32> to vector<2x128xf32>
    %10 = vector.extract_strided_slice %6 {offsets = [0, 384], sizes = [2, 128], strides = [1, 1]} : vector<2x1024xf32> to vector<2x128xf32>
    %11 = vector.extract_strided_slice %6 {offsets = [0, 512], sizes = [2, 128], strides = [1, 1]} : vector<2x1024xf32> to vector<2x128xf32>
    %12 = vector.extract_strided_slice %6 {offsets = [0, 640], sizes = [2, 128], strides = [1, 1]} : vector<2x1024xf32> to vector<2x128xf32>
    %13 = vector.extract_strided_slice %6 {offsets = [0, 768], sizes = [2, 128], strides = [1, 1]} : vector<2x1024xf32> to vector<2x128xf32>
    %14 = vector.extract_strided_slice %6 {offsets = [0, 896], sizes = [2, 128], strides = [1, 1]} : vector<2x1024xf32> to vector<2x128xf32>
    %15 = arith.addf %7, %8 : vector<2x128xf32>
    %16 = arith.addf %9, %10 : vector<2x128xf32>
    %17 = arith.addf %11, %12 : vector<2x128xf32>
    %18 = arith.addf %13, %14 : vector<2x128xf32>
    %19 = arith.addf %15, %16 : vector<2x128xf32>
    %20 = arith.addf %17, %18 : vector<2x128xf32>
    %21 = arith.addf %19, %20 : vector<2x128xf32>
    %c0_4 = arith.constant 0 : index
    %c0_5 = arith.constant 0 : index
    %22 = vector.load %arg4[%c0_4, %c0_5] : memref<2x128xf32, #tpu.memory_space<vmem>>, vector<2x128xf32>
    %23 = arith.addf %22, %21 : vector<2x128xf32>
    %c0_6 = arith.constant 0 : index
    %c0_7 = arith.constant 0 : index
    %24 = vector.load %arg4[%c0_6, %c0_7] : memref<2x128xf32, #tpu.memory_space<vmem>>, vector<2x128xf32>
    tpu.vector_store %arg4[%c0_6, %c0_7], %23 {strides = array<i32>} : memref<2x128xf32, #tpu.memory_space<vmem>>, vector<2x128xf32>,
    %c0_i32_8 = arith.constant 0 : i32
    %25 = arith.cmpi eq, %arg1, %c0_i32_8 : i32
    %26 = arith.extui %25 : i1 to i32
    %c0_i32_9 = arith.constant 0 : i32
    %27 = arith.cmpi ne, %26, %c0_i32_9 : i32
    scf.if %27 {
      %c0_10 = arith.constant 0 : index
      %c0_11 = arith.constant 0 : index
      %28 = vector.load %arg4[%c0_10, %c0_11] : memref<2x128xf32, #tpu.memory_space<vmem>>, vector<2x128xf32>
      %cst = arith.constant dense<0.000000e+00> : vector<2xf32>
      %29 = vector.multi_reduction <add>, %28, %cst [1] : vector<2x128xf32> to vector<2xf32>
      %30 = vector.shape_cast %29 : vector<2xf32> to vector<2x1xf32>
      %cst_12 = arith.constant 9.765625E-4 : f32
      %31 = vector.broadcast %cst_12 : f32 to vector<2x1xf32>
      %32 = arith.mulf %30, %31 : vector<2x1xf32>
      %33 = vector.shape_cast %32 : vector<2x1xf32> to vector<2x1xf32>
      %34 = vector.broadcast %33 : vector<2x1xf32> to vector<2x128xf32>
      %c0_13 = arith.constant 0 : index
      %c0_14 = arith.constant 0 : index
      %35 = vector.load %arg4[%c0_13, %c0_14] : memref<2x128xf32, #tpu.memory_space<vmem>>, vector<2x128xf32>
      tpu.vector_store %arg4[%c0_13, %c0_14], %34 {strides = array<i32>} : memref<2x128xf32, #tpu.memory_space<vmem>>, vector<2x128xf32>,
    } else {
    }
    return
  }
  func.func @transform_0(%arg0: i32, %arg1: i32) -> (i32, i32) {
    %c0_i32 = arith.constant 0 : i32
    return %arg0, %arg1 : i32, i32
  }
  func.func @transform_1(%arg0: i32, %arg1: i32) -> (i32, i32) {
    %c0_i32 = arith.constant 0 : i32
    return %arg0, %arg1 : i32, i32
  }
  func.func @transform_2(%arg0: i32, %arg1: i32) -> (i32, i32) {
    %c0_i32 = arith.constant 0 : i32
    %c0_i32_0 = arith.constant 0 : i32
    return %arg0, %c0_i32 : i32, i32
  }
}

</mosaic_0001>

<bundles_post_ra>
// kernel: tpu_custom_call.1
= control target key start
LH: loop header
LB: loop body
LE: loop exit
PB: predicated region body
PF: predicated region fallthrough
CT: control target
= control target key end

     0   :  { %7 = vsyncpa [#allocation3], 0  ;;  %s197_s0 = inlined_call_operand.hbm [shape: f32[2,1024], index: 0, kind: input, shape index: {}]   ;;  %s198_s1 = inlined_call_operand.hbm [shape: f32[2,1024], index: 1, kind: input, shape index: {}]   ;;  %s199_s2 = inlined_call_operand.hbm [shape: f32[2,128], index: 2, kind: output, shape index: {}]  }
   0x1   :  { %8 = vsyncpa [#allocation6], 0 }
   0x2   :  { %9 = vsyncpa [#allocation4], 0  ;;  %s169_s9 = smov [#allocation2]   ;;  %s170_s11 = smov [#allocation5]  }
   0x3   :  { %s16_s10 = sshll.u32 %s169_s9, 4  ;;  %s26_s12 = sshll.u32 %s170_s11, 4  ;;  %s17_s10 = int_to_ptr.vmem [resolvable:$true] %s16_s10  ;;  %s27_s12 = int_to_ptr.vmem [resolvable:$true] %s26_s12 }
   0x4   :  { %s111_s13 = scalar_lea.vmem %s17_s10, 256  ;;  %p116_p1 = scmp.lt.s32.totalorder %s17_s10, %s17_s10 }
   0x5   :  { %p112_p0 = scmp.ne.s32.totalorder %s17_s10, %s111_s13  ;;  %p117_p2 = scmp.lt.s32.totalorder %s111_s13, %s111_s13 }
   0x7   :  { %p118_p3 = por %p117_p2, %p116_p1 }
   0x9   :  { %p119_p4 = pnand %p118_p3, %p112_p0 }
   0xb   :  { %122 = shalt.err (!%p119_p4)
}
   0xc   :  { %19 = dma.hbm_to_vmem [thread:$0]  %s197_s0, 256, %s17_s10, [#allocation3]  }
   0xd   :  { %s131_s16 = scalar_lea.vmem %s27_s12, 256  ;;  %p136_p6 = scmp.lt.s32.totalorder %s27_s12, %s27_s12 }
   0xe   :  { %p132_p5 = scmp.ne.s32.totalorder %s27_s12, %s131_s16  ;;  %p137_p7 = scmp.lt.s32.totalorder %s131_s16, %s131_s16 }
  0x10   :  { %p138_p8 = por %p137_p7, %p136_p6 }
  0x12   :  { %p139_p9 = pnand %p138_p8, %p132_p5 }
  0x14   :  { %142 = shalt.err (!%p139_p9)
}
  0x15   :  { %29 = dma.hbm_to_vmem [thread:$0]  %s198_s1, 256, %s27_s12, [#allocation6]  }
  0x16   :  { %163 = dma.done.wait [#allocation3], 256  }
  0x17   :  { %164 = vsyncadd [#allocation3], 4294967040 }
  0x18   :  { %165 = dma.done.wait [#allocation6], 256  }
  0x19   :  { %166 = vsyncadd [#allocation6], 4294967040  ;;  %v171_v0 = vmov 0.0   ;;  %v41_v1 = vld [vmem:[#allocation2] sm:$0xff]  ;;  %v42_v2 = vld [vmem:[#allocation2 + $0x8] sm:$0xff]  ;;  %vm77_vm0 = vcmask 1041408  }
  0x1a   :  { %40 = vst [vmem:[#allocation7] sm:$0x3] %v171_v0  ;;  %v43_v3 = vld [vmem:[#allocation5] sm:$0xff]  ;;  %v44_v4 = vld [vmem:[#allocation5 + $0x8] sm:$0xff]  ;;  %s172_s0 = smov [#allocation7]  }
  0x1b   :  { %v45_v5 = vsub.f32 %v41_v1, %v43_v3  ;;  %v46_v6 = vsub.f32 %v42_v2, %v44_v4  ;;  %s89_s1 = sshll.u32 %s172_s0, 4  ;;  %s90_s1 = int_to_ptr.vmem [resolvable:$true] %s89_s1 }
  0x1c   :  { %s143_s19 = scalar_lea.vmem %s90_s1, 32  ;;  %p148_p11 = scmp.lt.s32.totalorder %s90_s1, %s90_s1 }
  0x1d   :  { %v47_v7 = vmul.f32 %v45_v5, %v45_v5  ;;  %v48_v8 = vmul.f32 %v46_v6, %v46_v6  ;;  %p144_p10 = scmp.ne.s32.totalorder %s90_s1, %s143_s19  ;;  %p149_p12 = scmp.lt.s32.totalorder %s143_s19, %s143_s19 }
  0x1f   :  { %v50_v9 = vrot.slane %v47_v7, 2  ;;  %v53_v10 = vrot.slane %v47_v7, 4  ;;  %v55_v11 = vrot.slane %v47_v7, 6  ;;  %v59_v12 = vrot.slane %v48_v8, 2  ;;  %p150_p13 = por %p149_p12, %p148_p11 }
  0x20   :  { %v62_v13 = vrot.slane %v48_v8, 4  ;;  %v64_v14 = vrot.slane %v48_v8, 6 }
  0x21   :  { %v52_v15 = vadd.f32 %v50_v9, %v47_v7  ;;  %v57_v16 = vadd.f32 %v55_v11, %v53_v10  ;;  %v61_v17 = vadd.f32 %v59_v12, %v48_v8  ;;  %v70_v21 = vld [vmem:[#allocation7] sm:$0x3]  ;;  %p151_p0 = pnand %p150_p13, %p144_p10 }
  0x22   :  { %v66_v18 = vadd.f32 %v64_v14, %v62_v13 }
  0x23   :  { %v67_v19 = vadd.f32 %v57_v16, %v52_v15 }
  0x24   :  { %v68_v20 = vadd.f32 %v66_v18, %v61_v17 }
  0x26   :  { %v69_v22 = vadd.f32 %v68_v20, %v67_v19 }
  0x28   :  { %v71_v23 = vadd.f32 %v70_v21, %v69_v22 }
  0x2a   :  { %72 = vst [vmem:[#allocation7] sm:$0x3] %v71_v23 }
  0x31   :  { %v76_v24 = vld [vmem:[#allocation7] sm:$0x3] }
  0x32   :  { %v78_v25 = vsel %vm77_vm0, %v76_v24, 0.0 }
  0x33   :  { %79 = vadd.xlane.f32.xlu0 %v78_v25 }
  0xbc   :  { %v80_v26 = vpop.xlane.xlu0 %79 }
  0xbd   :  { %v81_v27 = vmul.f32 0.0009765625, %v80_v26 }
  0xbf   :  { %82 = vst [vmem:[#allocation7] sm:$0x3] %v81_v27 }
  0xc0   :  { %154 = shalt.err (!%p151_p0)
}
  0xc1   :  { %92 = dma.vmem_to_hbm [thread:$0]  %s90_s1, 32, %s199_s2, [#allocation4]  }
  0xc2   :  { %167 = dma.done.wait [#allocation4], 32  }
  0xc3   :  { %168 = vsyncadd [#allocation4], 4294967264 }
  0xc4   :  { %96 = vsyncpa [#allocation3], 1 }
  0xc5   :  { %97 = vsyncpa [#allocation6], 1 }
  0xc6   :  { %98 = vsyncpa [#allocation4], 1 }

</bundles_post_ra>
